<compile_context>
chip_gen: v7x
topology: tpu7x:2x2x1
jax: 0.10.0
libtpu: 0.0.40
codegen_flags: <defaults>
</compile_context>

<pallas_src>
import functools
import math

import jax
import jax.numpy as jnp
from jax.experimental import pallas as pl
from jax.experimental.pallas import tpu as pltpu


_VMEM_LIMIT_BYTES = 32 * 1024 * 1024            # explicit: v5e default scoped is 16 MiB
_FUSED_VMEM_BUDGET = int(_VMEM_LIMIT_BYTES * 0.75)   # ~25% headroom for weights/metadata
_BLOCK_TARGET_BYTES = 2 * 1024 * 1024           # target streamed block size (Path A)
_HW_TILE_MAX = 2048                             # spatial tile cap (multiple of 128)


# ----------------------------------------------------------------------------
# Path A: fully fused kernel (pool -> SE MLP -> rescale) for Nb samples / step.
# ----------------------------------------------------------------------------
def _cab_fused_kernel(x_ref, w1t_ref, w2_ref, o_ref):
    # x_ref: (Nb, C, HW)   w1t_ref: (C, Cr) == W1^T   w2_ref: (C, Cr)   o_ref: (Nb, C, HW)
    x = x_ref[...]                                                      # native dtype
    # Global average pool over the spatial (lane) axis, f32 accumulation only.
    y = jnp.mean(x, axis=-1, keepdims=True, dtype=jnp.float32)          # (Nb, C, 1)
    # Squeeze: z1[n,r] = relu(sum_c W1[r,c] * y[n,c])  (VPU mul + sublane reduce).
    z1 = jnp.sum(w1t_ref[...][None, :, :] * y, axis=1, keepdims=True)   # (Nb, 1, Cr)
    z1 = jnp.maximum(z1, 0.0)
    # Excite: z2[n,c] = sigmoid(sum_r W2[c,r] * z1[n,r]) (VPU mul + lane reduce).
    z2 = jax.nn.sigmoid(
        jnp.sum(w2_ref[...][None, :, :] * z1, axis=-1, keepdims=True))  # (Nb, C, 1)
    # Channel-wise rescale in the native dtype (no full-tile f32 upcast); lane-dense store.
    o_ref[...] = x * z2.astype(x.dtype)


# ----------------------------------------------------------------------------
# Path B pass 1: spatially tiled pool accumulation + SE MLP -> per-sample scale.
# ----------------------------------------------------------------------------
def _cab_pool_kernel(x_ref, w1t_ref, w2_ref, s_ref, acc_ref, *, hw, hw_tile, needs_mask):
    # x_ref: (1, C, T)  w1t_ref: (C, Cr)  w2_ref: (C, Cr)  s_ref: (1, C, 1)  acc: (C, 1) f32
    t = pl.program_id(1)

    @pl.when(t == 0)
    def _():
        acc_ref[...] = jnp.zeros_like(acc_ref)

    x = x_ref[0]                                                        # (C, T)
    if needs_mask:
        # Mask the padded tail of the last (partial) spatial tile.
        lane = jax.lax.broadcasted_iota(jnp.int32, x.shape, 1)
        x = jnp.where(t * hw_tile + lane < hw, x, jnp.zeros((), x.dtype))
    acc_ref[...] += jnp.sum(x, axis=-1, keepdims=True, dtype=jnp.float32)

    @pl.when(t == pl.num_programs(1) - 1)
    def _():
        y = acc_ref[...] * (1.0 / hw)                                   # (C, 1) mean
        z1 = jnp.maximum(
            jnp.sum(w1t_ref[...] * y, axis=0, keepdims=True), 0.0)      # (1, Cr)
        z2 = jax.nn.sigmoid(
            jnp.sum(w2_ref[...] * z1, axis=-1, keepdims=True))          # (C, 1)
        s_ref[0] = z2.astype(s_ref.dtype)


# ----------------------------------------------------------------------------
# Path B pass 2: spatially tiled channel-wise rescale.
# ----------------------------------------------------------------------------
def _cab_scale_kernel(x_ref, s_ref, o_ref):
    # x_ref: (1, C, T)   s_ref: (1, C, 1)   o_ref: (1, C, T)
    o_ref[0] = x_ref[0] * s_ref[0].astype(o_ref.dtype)


def cab_forward(x_nchw, w1, w2, *, force_tiled=False, hw_tile=None, donate_x=False):
    """x_nchw: (N, C, H, W); w1: (C//r, C); w2: (C, C//r) -> (N, C, H, W)."""
    N, C, H, W = x_nchw.shape
    Cr = w1.shape[0]
    HW = H * W
    itemsize = jnp.dtype(x_nchw.dtype).itemsize
    per_sample_bytes = C * HW * itemsize

    x = x_nchw.reshape(N, C, HW)        # NCHW is (C, H*W)-contiguous: free view
    w1t = jnp.transpose(w1)             # (C, Cr): contraction axis lives on sublanes

    io_alias = {0: 0} if donate_x else {}
    compiler = lambda sem: pltpu.CompilerParams(
        dimension_semantics=sem, vmem_limit_bytes=_VMEM_LIMIT_BYTES)

    # Gate whole-image blocks on the double-buffered (2 in + 2 out) VMEM footprint.
    fused_fits = 4 * per_sample_bytes <= _FUSED_VMEM_BUDGET
    if fused_fits and not force_tiled:
        # ---- Path A: single fused call, Nb samples per block. ----
        nb_cap = max(1, min(N,
                            _BLOCK_TARGET_BYTES // per_sample_bytes,
                            _FUSED_VMEM_BUDGET // (4 * per_sample_bytes)))
        nb = 1
        for d in range(1, N + 1):       # largest divisor of N within the cap
            if N % d == 0 and d <= nb_cap:
                nb = d
        out = pl.pallas_call(
            _cab_fused_kernel,
            out_shape=jax.ShapeDtypeStruct((N, C, HW), x.dtype),
            grid=(N // nb,),
            in_specs=[
                pl.BlockSpec((nb, C, HW), lambda b: (b, 0, 0)),
                pl.BlockSpec((C, Cr), lambda b: (0, 0)),
                pl.BlockSpec((C, Cr), lambda b: (0, 0)),
            ],
            out_specs=pl.BlockSpec((nb, C, HW), lambda b: (b, 0, 0)),
            input_output_aliases=io_alias,
            compiler_params=compiler(("parallel",)),
        )(x, w1t, w2)
        return out.reshape(N, C, H, W)

    # ---- Path B: spatially tiled two-pass (pool + SE, then rescale). ----
    if hw_tile is None:
        hw_tile = min(_HW_TILE_MAX, ((HW + 127) // 128) * 128)   # lane-dense tile
    grid_hw = pl.cdiv(HW, hw_tile)
    needs_mask = (HW % hw_tile) != 0

    pool_kernel = functools.partial(
        _cab_pool_kernel, hw=HW, hw_tile=hw_tile, needs_mask=needs_mask)

    scale = pl.pallas_call(
        pool_kernel,
        out_shape=jax.ShapeDtypeStruct((N, C, 1), jnp.float32),
        grid=(N, grid_hw),
        in_specs=[
            pl.BlockSpec((1, C, hw_tile), lambda n, t: (n, 0, t)),
            pl.BlockSpec((C, Cr), lambda n, t: (0, 0)),
            pl.BlockSpec((C, Cr), lambda n, t: (0, 0)),
        ],
        out_specs=pl.BlockSpec((1, C, 1), lambda n, t: (n, 0, 0)),
        scratch_shapes=[pltpu.VMEM((C, 1), jnp.float32)],
        compiler_params=compiler(("parallel", "arbitrary")),
    )(x, w1t, w2)

    out = pl.pallas_call(
        _cab_scale_kernel,
        out_shape=jax.ShapeDtypeStruct((N, C, HW), x.dtype),
        grid=(N, grid_hw),
        in_specs=[
            pl.BlockSpec((1, C, hw_tile), lambda n, t: (n, 0, t)),
            pl.BlockSpec((1, C, 1), lambda n, t: (n, 0, 0)),
        ],
        out_specs=pl.BlockSpec((1, C, hw_tile), lambda n, t: (n, 0, t)),
        input_output_aliases=io_alias,
        compiler_params=compiler(("parallel", "parallel")),
    )(x, scale)
    return out.reshape(N, C, H, W)


# ----------------------------------------------------------------------------
# Pure-JAX reference (for validation).
# ----------------------------------------------------------------------------
def cab_ref(x, w1, w2):
    y = jnp.mean(x, axis=(2, 3), keepdims=True)                       # (N, C, 1, 1)
    z1 = jnp.maximum(jnp.einsum("rc,ncij->nrij", w1, y), 0.0)         # 1x1 conv + ReLU
    z2 = jax.nn.sigmoid(jnp.einsum("cr,nrij->ncij", w2, z1))          # 1x1 conv + sigmoid
    return x * z2


if __name__ == "__main__":
    key = jax.random.PRNGKey(0)

    def make_params(k, C, reduction):
        Cr = C // reduction
        k1, k2 = jax.random.split(k)
        b1 = 1.0 / math.sqrt(C)       # Conv2d-style uniform init, kernel_size=1
        b2 = 1.0 / math.sqrt(Cr)
        w1 = jax.random.uniform(k1, (Cr, C), jnp.float32, -b1, b1)    # conv_du[0] weight
        w2 = jax.random.uniform(k2, (C, Cr), jnp.float32, -b2, b2)    # conv_du[2] weight
        return w1, w2

    def check(out, ref, name):
        err = float(jnp.max(jnp.abs(out - ref)))
        if not jnp.allclose(out, ref, atol=1e-5, rtol=1e-5):
            raise SystemExit(f"MISMATCH ({name}) vs reference, max abs err = {err:e}")

    # CAB(nc=16, reduction=8, bias=False).
    kw, key = jax.random.split(key)
    C, reduction = 16, 8
    w1, w2 = make_params(kw, C, reduction)

    # 1) Fused path (batch-packed blocks).
    kx, key = jax.random.split(key)
    x = jax.random.normal(kx, (2, C, 16, 16), jnp.float32)
    out = jax.block_until_ready(cab_forward(x, w1, w2))
    assert out.shape == x.shape
    check(out, cab_ref(x, w1, w2), "fused")

    # 2) Spatially tiled path, tile divides H*W (HW = 384 = 3 * 128).
    kx, key = jax.random.split(key)
    x = jax.random.normal(kx, (2, C, 16, 24), jnp.float32)
    out = jax.block_until_ready(cab_forward(x, w1, w2, force_tiled=True, hw_tile=128))
    check(out, cab_ref(x, w1, w2), "tiled")

    # 3) Spatially tiled path with a masked partial last tile (HW = 400).
    kx, key = jax.random.split(key)
    x = jax.random.normal(kx, (2, C, 20, 20), jnp.float32)
    out = jax.block_until_ready(cab_forward(x, w1, w2, force_tiled=True, hw_tile=128))
    check(out, cab_ref(x, w1, w2), "tiled+mask")

    print("KERNEL_OK")
</pallas_src>

<mosaic_0001>
module attributes {stable_mosaic.version = 11 : i64} {
  func.func @_cab_fused_kernel(%arg0: i32, %arg1: memref<2x16x256xf32, #tpu.memory_space<vmem>>, %arg2: memref<16x2xf32, #tpu.memory_space<vmem>>, %arg3: memref<16x2xf32, #tpu.memory_space<vmem>>, %arg4: memref<2x16x256xf32, #tpu.memory_space<vmem>>) attributes {dimension_semantics = [#tpu.dimension_semantics<parallel>], iteration_bounds = array<i64: 1>, scalar_prefetch = 0 : i64, scratch_operands = 0 : i64, tpu.core_type = #tpu.core_type<tc>, window_params = [{transform_indices = @transform_0, window_bounds = array<i64: 2, 16, 256>}, {pipeline_mode = #tpu.pipeline_mode<synchronous>, transform_indices = @transform_1, window_bounds = array<i64: 16, 2>}, {pipeline_mode = #tpu.pipeline_mode<synchronous>, transform_indices = @transform_2, window_bounds = array<i64: 16, 2>}, {transform_indices = @transform_3, window_bounds = array<i64: 2, 16, 256>}]} {
    %c0 = arith.constant 0 : index
    %c0_0 = arith.constant 0 : index
    %c0_1 = arith.constant 0 : index
    %0 = vector.load %arg1[%c0, %c0_0, %c0_1] : memref<2x16x256xf32, #tpu.memory_space<vmem>>, vector<2x16x256xf32>
    %cst = arith.constant dense<0.000000e+00> : vector<2x16xf32>
    %1 = vector.multi_reduction <add>, %0, %cst [2] : vector<2x16x256xf32> to vector<2x16xf32>
    %2 = vector.shape_cast %1 : vector<2x16xf32> to vector<2x16x1xf32>
    %cst_2 = arith.constant 2.560000e+02 : f32
    %3 = vector.broadcast %cst_2 : f32 to vector<2x16x1xf32>
    %4 = arith.divf %2, %3 : vector<2x16x1xf32>
    %c0_3 = arith.constant 0 : index
    %c0_4 = arith.constant 0 : index
    %5 = vector.load %arg2[%c0_3, %c0_4] : memref<16x2xf32, #tpu.memory_space<vmem>>, vector<16x2xf32>
    %6 = vector.shape_cast %5 : vector<16x2xf32> to vector<1x16x2xf32>
    %7 = vector.broadcast %6 : vector<1x16x2xf32> to vector<2x16x2xf32>
    %8 = vector.broadcast %4 : vector<2x16x1xf32> to vector<2x16x2xf32>
    %9 = arith.mulf %7, %8 : vector<2x16x2xf32>
    %cst_5 = arith.constant dense<0.000000e+00> : vector<2x2xf32>
    %10 = vector.multi_reduction <add>, %9, %cst_5 [1] : vector<2x16x2xf32> to vector<2x2xf32>
    %11 = vector.shape_cast %10 : vector<2x2xf32> to vector<2x1x2xf32>
    %cst_6 = arith.constant 0.000000e+00 : f32
    %12 = vector.broadcast %cst_6 : f32 to vector<2x1x2xf32>
    %13 = arith.maximumf %11, %12 : vector<2x1x2xf32>
    %c0_7 = arith.constant 0 : index
    %c0_8 = arith.constant 0 : index
    %14 = vector.load %arg3[%c0_7, %c0_8] : memref<16x2xf32, #tpu.memory_space<vmem>>, vector<16x2xf32>
    %15 = vector.shape_cast %14 : vector<16x2xf32> to vector<1x16x2xf32>
    %16 = vector.broadcast %15 : vector<1x16x2xf32> to vector<2x16x2xf32>
    %17 = vector.broadcast %13 : vector<2x1x2xf32> to vector<2x16x2xf32>
    %18 = arith.mulf %16, %17 : vector<2x16x2xf32>
    %cst_9 = arith.constant dense<0.000000e+00> : vector<2x16xf32>
    %19 = vector.multi_reduction <add>, %18, %cst_9 [2] : vector<2x16x2xf32> to vector<2x16xf32>
    %20 = vector.shape_cast %19 : vector<2x16xf32> to vector<2x16x1xf32>
    %21 = arith.negf %20 : vector<2x16x1xf32>
    %22 = math.exp %21 : vector<2x16x1xf32>
    %cst_10 = arith.constant 1.000000e+00 : f32
    %23 = vector.broadcast %cst_10 : f32 to vector<2x16x1xf32>
    %24 = arith.addf %23, %22 : vector<2x16x1xf32>
    %25 = arith.divf %23, %24 : vector<2x16x1xf32>
    %26 = vector.broadcast %25 : vector<2x16x1xf32> to vector<2x16x256xf32>
    %27 = arith.mulf %0, %26 : vector<2x16x256xf32>
    %c0_11 = arith.constant 0 : index
    %c0_12 = arith.constant 0 : index
    %c0_13 = arith.constant 0 : index
    %28 = vector.load %arg4[%c0_11, %c0_12, %c0_13] : memref<2x16x256xf32, #tpu.memory_space<vmem>>, vector<2x16x256xf32>
    tpu.vector_store %arg4[%c0_11, %c0_12, %c0_13], %27 {strides = array<i32>} : memref<2x16x256xf32, #tpu.memory_space<vmem>>, vector<2x16x256xf32>,
    return
  }
  func.func @transform_0(%arg0: i32) -> (i32, i32, i32) {
    %c0_i32 = arith.constant 0 : i32
    %c0_i32_0 = arith.constant 0 : i32
    %c0_i32_1 = arith.constant 0 : i32
    return %arg0, %c0_i32, %c0_i32_0 : i32, i32, i32
  }
  func.func @transform_1(%arg0: i32) -> (i32, i32) {
    %c0_i32 = arith.constant 0 : i32
    %c0_i32_0 = arith.constant 0 : i32
    %c0_i32_1 = arith.constant 0 : i32
    return %c0_i32, %c0_i32_0 : i32, i32
  }
  func.func @transform_2(%arg0: i32) -> (i32, i32) {
    %c0_i32 = arith.constant 0 : i32
    %c0_i32_0 = arith.constant 0 : i32
    %c0_i32_1 = arith.constant 0 : i32
    return %c0_i32, %c0_i32_0 : i32, i32
  }
  func.func @transform_3(%arg0: i32) -> (i32, i32, i32) {
    %c0_i32 = arith.constant 0 : i32
    %c0_i32_0 = arith.constant 0 : i32
    %c0_i32_1 = arith.constant 0 : i32
    return %arg0, %c0_i32, %c0_i32_0 : i32, i32, i32
  }
}

</mosaic_0001>

<bundles_post_ra>
// kernel: tpu_custom_call.1
= control target key start
LH: loop header
LB: loop body
LE: loop exit
PB: predicated region body
PF: predicated region fallthrough
CT: control target
= control target key end

     0   :  { %8 = vsyncpa [#allocation3], 0  ;;  %s334_s0 = inlined_call_operand.hbm [shape: f32[2,16,256], index: 0, kind: input, shape index: {}]   ;;  %s335_s1 = inlined_call_operand.vmem [shape: f32[16,2], index: 1, kind: input, shape index: {}]   ;;  %s336_s2 = inlined_call_operand.vmem [shape: f32[16,2], index: 2, kind: input, shape index: {}]   ;;  %s337_s3 = inlined_call_operand.hbm [shape: f32[2,16,256], index: 3, kind: output, shape index: {}]  }
   0x1   :  { %9 = vsyncpa [#allocation4], 0  ;;  %s228_s12 = smov [#allocation2]   ;;  %s180_s16 = scalar_lea.hbm %s334_s0, 1024 }
   0x2   :  { %s15_s13 = sshll.u32 %s228_s12, 4  ;;  %p181_p0 = scmp.ne.s32.totalorder %s334_s0, %s180_s16  ;;  %s16_s13 = int_to_ptr.vmem [resolvable:$true] %s15_s13 }
   0x3   :  { %p184_p1 = scmp.lt.u32.totalorder %s180_s16, %s334_s0 }
   0x5   :  { %p186_p2 = pnand %p184_p1, %p181_p0 }
   0x7   :  { %189 = shalt.err (!%p186_p2)
}
   0x8   :  { %s190_s21 = scalar_lea.vmem %s16_s13, 1024  ;;  %p195_p4 = scmp.lt.s32.totalorder %s16_s13, %s16_s13 }
   0x9   :  { %p191_p3 = scmp.ne.s32.totalorder %s16_s13, %s190_s21  ;;  %p196_p5 = scmp.lt.s32.totalorder %s190_s21, %s190_s21 }
   0xb   :  { %p197_p6 = por %p196_p5, %p195_p4 }
   0xd   :  { %p198_p7 = pnand %p197_p6, %p191_p3 }
   0xf   :  { %201 = shalt.err (!%p198_p7)
}
  0x10   :  { %s229_s22 = smov 256   ;;  %s230_s23 = smov 16  }
  0x11   :  { %21 = dma.hbm_to_vmem [thread:$0]  %s334_s0, 1024, %s16_s13, [#allocation3], %s229_s22, %s229_s22, %s230_s23  }
  0x12   :  { %224 = dma.done.wait [#allocation3], 1024  }
  0x13   :  { %225 = vsyncadd [#allocation3], 4294966272  ;;  %v267_v0 = vld [vmem:[#allocation2 + $0x20] sm:$0xff]  ;;  %v269_v1 = vld [vmem:[#allocation2 + $0x28] sm:$0xff]  ;;  %vm60_vm0 = vcmask 15360  }
  0x14   :  { %v271_v2 = vld [vmem:[#allocation2] sm:$0xff]  ;;  %v43_v3 = vadd.f32 %v269_v1, %v267_v0  ;;  %v275_v4 = vld [vmem:[#allocation2 + $0x8] sm:$0xff]  ;;  %v277_v5 = vld [vmem:[#allocation2 + $0x30] sm:$0xff] }
  0x15   :  { %v279_v6 = vld [vmem:[#allocation2 + $0x38] sm:$0xff]  ;;  %v37_v7 = vadd.f32 %v275_v4, %v271_v2  ;;  %v283_v8 = vld [vmem:[#allocation2 + $0x10] sm:$0xff]  ;;  %v54_v15 = vld [vmem:[%s335_s1] sm:$0xff] }
  0x16   :  { %v285_v9 = vld [vmem:[#allocation2 + $0x18] sm:$0xff]  ;;  %44 = vadd.xlane.f32.xlu1 %v43_v3  ;;  %v46_v10 = vadd.f32 %v279_v6, %v277_v5  ;;  %v55_v18 = vld [vmem:[%s335_s1 + $0x8] sm:$0xff]  ;;  %v81_v45 = vld [vmem:[%s336_s2] sm:$0xff] }
  0x17   :  { %38 = vadd.xlane.f32.xlu0 %v37_v7  ;;  %v40_v11 = vadd.f32 %v285_v9, %v283_v8  ;;  %v82_v44 = vld [vmem:[%s336_s2 + $0x8] sm:$0xff]  ;;  %s231_s2 = smov [#allocation5]  }
  0x18   :  { %s144_s5 = sshll.u32 %s231_s2, 4  ;;  %s145_s5 = int_to_ptr.vmem [resolvable:$true] %s144_s5 }
  0x19   :  { %s202_s6 = scalar_lea.vmem %s145_s5, 1024  ;;  %p207_p9 = scmp.lt.s32.totalorder %s145_s5, %s145_s5 }
  0x1a   :  { %47 = vadd.xlane.f32.xlu1 %v46_v10  ;;  %p203_p8 = scmp.ne.s32.totalorder %s145_s5, %s202_s6  ;;  %p208_p10 = scmp.lt.s32.totalorder %s202_s6, %s202_s6 }
  0x1b   :  { %41 = vadd.xlane.f32.xlu0 %v40_v11 }
  0x1c   :  { %p209_p11 = por %p208_p10, %p207_p9 }
  0x1e   :  { %p210_p12 = pnand %p209_p11, %p203_p8 }
  0xa3   :  { %v45_v12 = vpop.xlane.xlu1 %44 }
  0xa4   :  { %v52_v13 = vmul.f32 0.00390625, %v45_v12  ;;  %v39_v14 = vpop.xlane.xlu0 %38 }
  0xa5   :  { %v50_v16 = vmul.f32 0.00390625, %v39_v14 }
  0xa6   :  { %v58_v17 = vmul.f32 %v54_v15, %v52_v13 }
  0xa7   :  { %v48_v19 = vpop.xlane.xlu1 %47  ;;  %v56_v22 = vmul.f32 %v54_v15, %v50_v16 }
  0xa8   :  { %v53_v20 = vmul.f32 0.00390625, %v48_v19  ;;  %v42_v21 = vpop.xlane.xlu0 %41  ;;  %v70_v24 = vsel %vm60_vm0, %v58_v17, 0.0 }
  0xa9   :  { %v51_v23 = vmul.f32 0.00390625, %v42_v21  ;;  %v61_v28 = vsel %vm60_vm0, %v56_v22, 0.0 }
  0xaa   :  { %v59_v25 = vmul.f32 %v55_v18, %v53_v20 }
  0xab   :  { %v57_v26 = vmul.f32 %v55_v18, %v51_v23 }
  0xac   :  { %v71_v27 = vsel %vm60_vm0, %v59_v25, 0.0 }
  0xad   :  { %v72_v29 = vadd.f32 %v71_v27, %v70_v24  ;;  %v62_v30 = vsel %vm60_vm0, %v57_v26, 0.0 }
  0xae   :  { %v63_v31 = vadd.f32 %v62_v30, %v61_v28 }
  0xaf   :  { %v73_v32 = vrot.slane %v72_v29, 4 }
  0xb0   :  { %v64_v33 = vrot.slane %v63_v31, 4 }
  0xb1   :  { %v74_v34 = vadd.f32 %v73_v32, %v72_v29 }
  0xb2   :  { %v65_v35 = vadd.f32 %v64_v33, %v63_v31 }
  0xb3   :  { %v75_v36 = vrot.slane %v74_v34, 2 }
  0xb4   :  { %v66_v37 = vrot.slane %v65_v35, 2 }
  0xb5   :  { %v76_v38 = vadd.f32 %v75_v36, %v74_v34 }
  0xb6   :  { %v67_v39 = vadd.f32 %v66_v37, %v65_v35 }
  0xb7   :  { %v77_v40 = vrot.slane %v76_v38, 1 }
  0xb8   :  { %v68_v41 = vrot.slane %v67_v39, 1 }
  0xb9   :  { %v78_v42 = vadd.f32 %v77_v40, %v76_v38 }
  0xba   :  { %v69_v43 = vadd.f32 %v68_v41, %v67_v39 }
  0xbb   :  { %v80_v47 = vmax.f32 %v78_v42, 0.0 }
  0xbc   :  { %v79_v46 = vmax.f32 %v69_v43, 0.0 }
  0xbd   :  { %v86_v52 = vmul.f32 %v82_v44, %v80_v47  ;;  %v85_v53 = vmul.f32 %v81_v45, %v80_v47 }
  0xbe   :  { %v84_v48 = vmul.f32 %v82_v44, %v79_v46  ;;  %v83_v49 = vmul.f32 %v81_v45, %v79_v46 }
  0xbf   :  { %v96_v54 = vsel %vm60_vm0, %v86_v52, 0.0  ;;  %v93_v55 = vsel %vm60_vm0, %v85_v53, 0.0 }
  0xc0   :  { %v90_v50 = vsel %vm60_vm0, %v84_v48, 0.0  ;;  %v87_v51 = vsel %vm60_vm0, %v83_v49, 0.0 }
  0xc1   :  { %91 = vadd.xlane.f32.xlu1 %v90_v50  ;;  %88 = vadd.xlane.f32.xlu0 %v87_v51 }
  0xc5   :  { %97 = vadd.xlane.f32.xlu1 %v96_v54  ;;  %94 = vadd.xlane.f32.xlu0 %v93_v55 }
 0x14e   :  { %v92_v56 = vpop.xlane.xlu1 %91  ;;  %v89_v57 = vpop.xlane.xlu0 %88 }
 0x14f   :  { %v157_v58 = vmul.f32 -1.442695, %v92_v56  ;;  %v156_v59 = vmul.f32 -1.442695, %v89_v57 }
 0x151   :  { %164 = vpow2.f32 %v157_v58 }
 0x152   :  { %166 = vpow2.f32 %v156_v59  ;;  %v98_v60 = vpop.xlane.xlu1 %97  ;;  %v95_v61 = vpop.xlane.xlu0 %94 }
 0x153   :  { %v159_v62 = vmul.f32 -1.442695, %v98_v60  ;;  %v158_v63 = vmul.f32 -1.442695, %v95_v61 }
 0x155   :  { %168 = vpow2.f32 %v159_v62 }
 0x156   :  { %170 = vpow2.f32 %v158_v63 }
 0x15b   :  { %v165_v3 = vpop.eup %164 }
 0x15c   :  { %v167_v7 = vpop.eup %166  ;;  %v112_v10 = vadd.f32 1.0, %v165_v3 }
 0x15d   :  { %v111_v11 = vadd.f32 1.0, %v167_v7 }
 0x15e   :  { %172 = vrcp.f32 %v112_v10 }
 0x15f   :  { %v169_v12 = vpop.eup %168  ;;  %174 = vrcp.f32 %v111_v11 }
 0x160   :  { %v171_v13 = vpop.eup %170  ;;  %v114_v14 = vadd.f32 1.0, %v169_v12 }
 0x161   :  { %v113_v15 = vadd.f32 1.0, %v171_v13 }
 0x162   :  { %176 = vrcp.f32 %v114_v14 }
 0x163   :  { %178 = vrcp.f32 %v113_v15 }
 0x168   :  { %v173_v16 = vpop.eup %172 }
 0x169   :  { %v175_v17 = vpop.eup %174  ;;  %v125_v18 = vmul.f32 %v173_v16, %v283_v8  ;;  %v126_v19 = vmul.f32 %v173_v16, %v285_v9 }
 0x16a   :  { %v123_v20 = vmul.f32 %v175_v17, %v271_v2  ;;  %v124_v21 = vmul.f32 %v175_v17, %v275_v4 }
 0x16b   :  { %133 = vst [vmem:[#allocation5 + $0x10] sm:$0xff] %v125_v18  ;;  %134 = vst [vmem:[#allocation5 + $0x18] sm:$0xff] %v126_v19 }
 0x16c   :  { %v177_v22 = vpop.eup %176  ;;  %131 = vst [vmem:[#allocation5] sm:$0xff] %v123_v20  ;;  %132 = vst [vmem:[#allocation5 + $0x8] sm:$0xff] %v124_v21 }
 0x16d   :  { %v179_v23 = vpop.eup %178  ;;  %v129_v24 = vmul.f32 %v177_v22, %v277_v5  ;;  %v130_v25 = vmul.f32 %v177_v22, %v279_v6 }
 0x16e   :  { %v127_v8 = vmul.f32 %v179_v23, %v267_v0  ;;  %v128_v9 = vmul.f32 %v179_v23, %v269_v1 }
 0x16f   :  { %137 = vst [vmem:[#allocation5 + $0x30] sm:$0xff] %v129_v24  ;;  %138 = vst [vmem:[#allocation5 + $0x38] sm:$0xff] %v130_v25 }
 0x170   :  { %135 = vst [vmem:[#allocation5 + $0x20] sm:$0xff] %v127_v8  ;;  %136 = vst [vmem:[#allocation5 + $0x28] sm:$0xff] %v128_v9 }
 0x171   :  { %213 = shalt.err (!%p210_p12)
}
 0x172   :  { %s214_s9 = scalar_lea.hbm %s337_s3, 1024 }
 0x173   :  { %p215_p13 = scmp.ne.s32.totalorder %s337_s3, %s214_s9  ;;  %p218_p0 = scmp.lt.u32.totalorder %s214_s9, %s337_s3 }
 0x175   :  { %p220_p1 = pnand %p218_p0, %p215_p13 }
 0x177   :  { %223 = shalt.err (!%p220_p1)
}
 0x178   :  { %150 = dma.vmem_to_hbm [thread:$0]  %s145_s5, 1024, %s337_s3, [#allocation4], %s229_s22, %s229_s22, %s230_s23  }
 0x179   :  { %226 = dma.done.wait [#allocation4], 1024  }
 0x17a   :  { %227 = vsyncadd [#allocation4], 4294966272 }
 0x17b   :  { %154 = vsyncpa [#allocation3], 1 }
 0x17c   :  { %155 = vsyncpa [#allocation4], 1 }

</bundles_post_ra>
